<compile_context>
chip_gen: v5e
topology: v5e:2x2
jax: 0.10.0
libtpu: 0.0.40
codegen_flags: <defaults>
</compile_context>

<pallas_src>
import math

import jax
import jax.numpy as jnp
from jax.experimental import pallas as pl
from jax.experimental import pallas as _pl_unused  # keep namespace explicit
from jax.experimental.pallas import tpu as pltpu  # noqa: F401  (available if needed)

# ----------------------- synthetic configuration ---------------------------
B = 2            # batch
T = 16           # observed timepoints in x_obs
S = 4            # observed species (last dim of x_obs)
F = 8            # conv filters inside ConditionalEncoder
K = 3            # conv filter size (over time)
H = 32           # params_dict['n_hidden']
D = 4            # procdata.device_depth
NL = 3           # len(parameters.l.list_of_params)   -> local  "z" params
NG = 2           # len(parameters.g_c.list_of_params) -> glob-cond "y" params
NGL = 2          # len(parameters.g.list_of_params)   -> global "x" params
P = NL + NG + NGL
TM1 = T - 1
L = TM1 - K + 1          # valid-conv output length
NSEG = 5                 # [enc_h, theta, clipped_theta, log_q_theta, log_p_theta]
OUT_W = 128              # lane-dense output slab width (one dense writeback DMA)

_HALF_LOG_2PI = 0.5 * math.log(2.0 * math.pi)


# ----------------------- fused forward kernel ------------------------------
def fused_encoder_kernel(x_ref, dev_ref, u_ref, wenc_ref, benc_ref,
                         fcw_ref, fcb_ref, wh_ref, wd_ref, bh_ref,
                         prior_ref, out_ref):
    x = x_ref[...]                                   # [B, T*S] flattened x_obs
    dev = dev_ref[...]                               # [B, D]   dev_1hot
    u = u_ref[...]                                   # [B, P]   reparam noise

    # --- ConditionalEncoder: (delta + Conv1d) folded into one matmul, ReLU,
    #     then the dense layer as one more consolidated matmul. -------------
    h1 = jnp.maximum(
        jnp.dot(x, wenc_ref[...], preferred_element_type=jnp.float32)
        + benc_ref[...], 0.0)                        # [B, L*F]
    h2 = (jnp.dot(h1, fcw_ref[...], preferred_element_type=jnp.float32)
          + fcb_ref[...])                            # [B, H]

    # --- all q heads merged column-wise: cols = [mu(local|gc|global) |
    #     log_prec(local|gc|global)]  ->  exactly two MXU pushes. -----------
    heads = (jnp.dot(h2, wh_ref[...], preferred_element_type=jnp.float32)
             + jnp.dot(dev, wd_ref[...], preferred_element_type=jnp.float32)
             + bh_ref[...])                          # [B, 2P]
    mu = heads[:, :P]                                # [B, P]
    lp = heads[:, P:]                                # [B, P]

    # --- reparameterized sample, log q, 4-sigma prior clip, log p ----------
    theta = mu + jnp.exp(-0.5 * lp) * u
    # log N(theta; mu, exp(-lp)) with (theta - mu) = exp(-lp/2) * u substituted.
    log_q = 0.5 * lp - _HALF_LOG_2PI - 0.5 * u * u
    p_mu = prior_ref[0]                              # [1, P]
    p_lp = prior_ref[1]                              # [1, P]
    p_sig = jnp.exp(-0.5 * p_lp)
    clipped = jnp.clip(theta, p_mu - 4.0 * p_sig, p_mu + 4.0 * p_sig)
    log_p = (0.5 * p_lp - _HALF_LOG_2PI
             - 0.5 * jnp.exp(p_lp) * (theta - p_mu) ** 2)

    # --- single lane-dense output slab (one DMA); host slices it -----------
    out_ref[...] = jnp.zeros((NSEG, B, OUT_W), jnp.float32)
    out_ref[0, :, :H] = h2
    out_ref[1, :, :P] = theta
    out_ref[2, :, :P] = clipped
    out_ref[3, :, :P] = log_q
    out_ref[4, :, :P] = log_p


@jax.jit
def encoder_forward(x_obs, dev_1hot, conds_obs, u, params):
    """One fused single-step pallas_call for the whole Encoder.forward."""
    # TODO(synk): conds_obs is forwarded to ds.build_q_* in the PyTorch code, but
    # the declared Linear heads only consume dev_1hot, so it is unused here.
    del conds_obs
    x_flat = x_obs.reshape(B, T * S)                 # layout-only host reshape
    slab = pl.pallas_call(
        fused_encoder_kernel,
        out_shape=jax.ShapeDtypeStruct((NSEG, B, OUT_W), jnp.float32),
    )(x_flat, dev_1hot, u,
      params["w_enc"], params["b_enc"], params["fc_w"], params["fc_b"],
      params["w_heads_h"], params["w_heads_d"], params["b_heads"],
      params["prior"])
    enc_h = slab[0, :, :H]
    theta = slab[1, :, :P]
    clipped_theta = slab[2, :, :P]
    log_q_theta = slab[3, :, :P]
    log_p_theta = slab[4, :, :P]
    return enc_h, theta, clipped_theta, log_q_theta, log_p_theta


# ----------------------- host-side parameter packing -----------------------
def build_params(key):
    ks = jax.random.split(key, 7)
    # ConditionalEncoder (PyTorch Conv1d weight [F,S,K], Linear weight [H, F*L])
    conv_w = 0.1 * jax.random.normal(ks[0], (F, S, K), jnp.float32)
    conv_b = 0.1 * jax.random.normal(ks[1], (F,), jnp.float32)
    fc_w = 0.1 * jax.random.normal(ks[2], (H, F * L), jnp.float32)
    fc_b = 0.1 * jax.random.normal(ks[3], (H,), jnp.float32)
    # local heads: NL mu columns then NL log_prec columns, Linear(H+D, 1, bias=True)
    w_loc = 0.1 * jax.random.normal(ks[4], (H + D, 2 * NL), jnp.float32)
    b_loc = 0.1 * jax.random.normal(ks[5], (1, 2 * NL), jnp.float32)
    # global-conditional heads: Linear(D, 1, bias=False), mu cols then log_prec cols
    w_gc = 0.1 * jax.random.normal(ks[6], (D, 2 * NG), jnp.float32)
    # global parameters: nn.Parameter(0.0) for mu, nn.Parameter(1.0) for log_prec
    mu_g = jnp.zeros((NGL,), jnp.float32)
    lp_g = jnp.ones((NGL,), jnp.float32)

    # -- fold (x[:,1:,:]-x[:,:-1,:]) + Conv1d(valid) into one [T*S, L*F] matrix
    w_enc4 = jnp.zeros((T, S, L, F), jnp.float32)
    for l in range(L):
        for k in range(K):
            tap = conv_w[:, :, k].T                               # [S, F]
            w_enc4 = w_enc4.at[l + k + 1, :, l, :].add(tap)
            w_enc4 = w_enc4.at[l + k, :, l, :].add(-tap)
    w_enc = w_enc4.reshape(T * S, L * F)
    b_enc = jnp.tile(conv_b, L).reshape(1, L * F)                 # bias per (l, f)

    # -- dense layer reshaped to the (l, f) flattening used by w_enc --------
    fc_w2 = jnp.transpose(fc_w.reshape(H, F, L), (2, 1, 0)).reshape(L * F, H)
    fc_b2 = fc_b.reshape(1, H)

    # -- merge ALL q heads column-wise: columns = [ mu(local|gc|global) |
    #    log_prec(local|gc|global) ]  ->  one [H,2P] and one [D,2P] matrix ---
    zh = jnp.zeros((H, NG + NGL), jnp.float32)
    w_heads_h = jnp.concatenate(
        [w_loc[:H, :NL], zh, w_loc[:H, NL:], zh], axis=1)         # [H, 2P]
    zd = jnp.zeros((D, NGL), jnp.float32)
    w_heads_d = jnp.concatenate(
        [w_loc[H:, :NL], w_gc[:, :NG], zd,
         w_loc[H:, NL:], w_gc[:, NG:], zd], axis=1)               # [D, 2P]
    zb = jnp.zeros((1, NG), jnp.float32)
    b_heads = jnp.concatenate(
        [b_loc[:, :NL], zb, mu_g[None, :],
         b_loc[:, NL:], zb, lp_g[None, :]], axis=1)               # [1, 2P]

    # -- standard-normal stand-in prior, stacked [mu, log_prec] -------------
    prior = jnp.zeros((2, 1, P), jnp.float32)

    return dict(w_enc=w_enc, b_enc=b_enc, fc_w=fc_w2, fc_b=fc_b2,
                w_heads_h=w_heads_h, w_heads_d=w_heads_d, b_heads=b_heads,
                prior=prior)


# ----------------------- pure-JAX reference (correctness check) ------------
def reference_forward(x_obs, dev_1hot, u, params):
    hi = jax.lax.Precision.HIGHEST
    x_flat = x_obs.reshape(B, T * S)
    h1 = jnp.maximum(jnp.dot(x_flat, params["w_enc"], precision=hi)
                     + params["b_enc"], 0.0)
    h2 = jnp.dot(h1, params["fc_w"], precision=hi) + params["fc_b"]
    heads = (jnp.dot(h2, params["w_heads_h"], precision=hi)
             + jnp.dot(dev_1hot, params["w_heads_d"], precision=hi)
             + params["b_heads"])
    mu, lp = heads[:, :P], heads[:, P:]
    theta = mu + jnp.exp(-0.5 * lp) * u
    log_q = 0.5 * lp - _HALF_LOG_2PI - 0.5 * u * u
    p_mu, p_lp = params["prior"][0], params["prior"][1]
    p_sig = jnp.exp(-0.5 * p_lp)
    clipped = jnp.clip(theta, p_mu - 4.0 * p_sig, p_mu + 4.0 * p_sig)
    log_p = (0.5 * p_lp - _HALF_LOG_2PI
             - 0.5 * jnp.exp(p_lp) * (theta - p_mu) ** 2)
    return h2, theta, clipped, log_q, log_p


# --------------------------------- main -------------------------------------
if __name__ == "__main__":
    key = jax.random.PRNGKey(0)
    k_x, k_c, k_u, k_p = jax.random.split(key, 4)

    # Placeholders (placeholders['x_obs'], ['dev_1hot'], ['conds_obs'], ['u'])
    x_obs = jax.random.normal(k_x, (B, T, S), jnp.float32)
    dev_1hot = jax.nn.one_hot(jnp.array([0, 2]), D, dtype=jnp.float32)
    conds_obs = jax.random.normal(k_c, (B, 2), jnp.float32)   # unused (see TODO)
    u = jax.random.normal(k_u, (B, P), jnp.float32)

    params = build_params(k_p)

    outs = encoder_forward(x_obs, dev_1hot, conds_obs, u, params)
    outs = jax.block_until_ready(outs)

    refs = reference_forward(x_obs, dev_1hot, u, params)
    names = ("enc_h", "theta", "clipped_theta", "log_q_theta", "log_p_theta")
    for name, got, want in zip(names, outs, refs):
        if not jnp.allclose(got, want, rtol=1e-2, atol=1e-2):
            raise AssertionError(
                f"{name} mismatch: max abs err {jnp.max(jnp.abs(got - want))}")

    print("KERNEL_OK")
</pallas_src>

<mosaic_0001>
module attributes {stable_mosaic.version = 11 : i64} {
  func.func @fused_encoder_kernel(%arg0: memref<2x64xf32, #tpu.memory_space<vmem>>, %arg1: memref<2x4xf32, #tpu.memory_space<vmem>>, %arg2: memref<2x7xf32, #tpu.memory_space<vmem>>, %arg3: memref<64x104xf32, #tpu.memory_space<vmem>>, %arg4: memref<1x104xf32, #tpu.memory_space<vmem>>, %arg5: memref<104x32xf32, #tpu.memory_space<vmem>>, %arg6: memref<1x32xf32, #tpu.memory_space<vmem>>, %arg7: memref<32x14xf32, #tpu.memory_space<vmem>>, %arg8: memref<4x14xf32, #tpu.memory_space<vmem>>, %arg9: memref<1x14xf32, #tpu.memory_space<vmem>>, %arg10: memref<2x1x7xf32, #tpu.memory_space<vmem>>, %arg11: memref<5x2x128xf32, #tpu.memory_space<vmem>>) attributes {dimension_semantics = [], scalar_prefetch = 0 : i64, scratch_operands = 0 : i64, tpu.core_type = #tpu.core_type<tc>} {
    %c0 = arith.constant 0 : index
    %c0_0 = arith.constant 0 : index
    %0 = vector.load %arg0[%c0, %c0_0] : memref<2x64xf32, #tpu.memory_space<vmem>>, vector<2x64xf32>
    %c0_1 = arith.constant 0 : index
    %c0_2 = arith.constant 0 : index
    %1 = vector.load %arg1[%c0_1, %c0_2] : memref<2x4xf32, #tpu.memory_space<vmem>>, vector<2x4xf32>
    %c0_3 = arith.constant 0 : index
    %c0_4 = arith.constant 0 : index
    %2 = vector.load %arg2[%c0_3, %c0_4] : memref<2x7xf32, #tpu.memory_space<vmem>>, vector<2x7xf32>
    %c0_5 = arith.constant 0 : index
    %c0_6 = arith.constant 0 : index
    %3 = vector.load %arg3[%c0_5, %c0_6] : memref<64x104xf32, #tpu.memory_space<vmem>>, vector<64x104xf32>
    %cst = arith.constant dense<0.000000e+00> : vector<2x104xf32>
    %4 = tpu.matmul %0, %3, %cst {dimension_numbers = #tpu.dot_dimension_numbers<[1], [0], [0], [1], [0, 0, 1, 1], [], []>} : vector<2x64xf32>, vector<64x104xf32>, vector<2x104xf32> -> vector<2x104xf32>
    %c0_7 = arith.constant 0 : index
    %c0_8 = arith.constant 0 : index
    %5 = vector.load %arg4[%c0_7, %c0_8] : memref<1x104xf32, #tpu.memory_space<vmem>>, vector<1x104xf32>
    %6 = vector.broadcast %5 : vector<1x104xf32> to vector<2x104xf32>
    %7 = arith.addf %4, %6 : vector<2x104xf32>
    %cst_9 = arith.constant 0.000000e+00 : f32
    %8 = vector.broadcast %cst_9 : f32 to vector<2x104xf32>
    %9 = arith.maximumf %7, %8 : vector<2x104xf32>
    %c0_10 = arith.constant 0 : index
    %c0_11 = arith.constant 0 : index
    %10 = vector.load %arg5[%c0_10, %c0_11] : memref<104x32xf32, #tpu.memory_space<vmem>>, vector<104x32xf32>
    %cst_12 = arith.constant dense<0.000000e+00> : vector<2x32xf32>
    %11 = tpu.matmul %9, %10, %cst_12 {dimension_numbers = #tpu.dot_dimension_numbers<[1], [0], [0], [1], [0, 0, 1, 1], [], []>} : vector<2x104xf32>, vector<104x32xf32>, vector<2x32xf32> -> vector<2x32xf32>
    %c0_13 = arith.constant 0 : index
    %c0_14 = arith.constant 0 : index
    %12 = vector.load %arg6[%c0_13, %c0_14] : memref<1x32xf32, #tpu.memory_space<vmem>>, vector<1x32xf32>
    %13 = vector.broadcast %12 : vector<1x32xf32> to vector<2x32xf32>
    %14 = arith.addf %11, %13 : vector<2x32xf32>
    %c0_15 = arith.constant 0 : index
    %c0_16 = arith.constant 0 : index
    %15 = vector.load %arg7[%c0_15, %c0_16] : memref<32x14xf32, #tpu.memory_space<vmem>>, vector<32x14xf32>
    %cst_17 = arith.constant dense<0.000000e+00> : vector<2x14xf32>
    %16 = tpu.matmul %14, %15, %cst_17 {dimension_numbers = #tpu.dot_dimension_numbers<[1], [0], [0], [1], [0, 0, 1, 1], [], []>} : vector<2x32xf32>, vector<32x14xf32>, vector<2x14xf32> -> vector<2x14xf32>
    %c0_18 = arith.constant 0 : index
    %c0_19 = arith.constant 0 : index
    %17 = vector.load %arg8[%c0_18, %c0_19] : memref<4x14xf32, #tpu.memory_space<vmem>>, vector<4x14xf32>
    %cst_20 = arith.constant dense<0.000000e+00> : vector<2x14xf32>
    %18 = tpu.matmul %1, %17, %cst_20 {dimension_numbers = #tpu.dot_dimension_numbers<[1], [0], [0], [1], [0, 0, 1, 1], [], []>} : vector<2x4xf32>, vector<4x14xf32>, vector<2x14xf32> -> vector<2x14xf32>
    %19 = arith.addf %16, %18 : vector<2x14xf32>
    %c0_21 = arith.constant 0 : index
    %c0_22 = arith.constant 0 : index
    %20 = vector.load %arg9[%c0_21, %c0_22] : memref<1x14xf32, #tpu.memory_space<vmem>>, vector<1x14xf32>
    %21 = vector.broadcast %20 : vector<1x14xf32> to vector<2x14xf32>
    %22 = arith.addf %19, %21 : vector<2x14xf32>
    %23 = vector.extract_strided_slice %22 {offsets = [0, 0], sizes = [2, 7], strides = [1, 1]} : vector<2x14xf32> to vector<2x7xf32>
    %24 = vector.extract_strided_slice %22 {offsets = [0, 7], sizes = [2, 7], strides = [1, 1]} : vector<2x14xf32> to vector<2x7xf32>
    %cst_23 = arith.constant -5.000000e-01 : f32
    %25 = vector.broadcast %cst_23 : f32 to vector<2x7xf32>
    %26 = arith.mulf %25, %24 : vector<2x7xf32>
    %27 = math.exp %26 : vector<2x7xf32>
    %28 = arith.mulf %27, %2 : vector<2x7xf32>
    %29 = arith.addf %23, %28 : vector<2x7xf32>
    %cst_24 = arith.constant 5.000000e-01 : f32
    %30 = vector.broadcast %cst_24 : f32 to vector<2x7xf32>
    %31 = arith.mulf %30, %24 : vector<2x7xf32>
    %cst_25 = arith.constant 0.918938517 : f32
    %32 = vector.broadcast %cst_25 : f32 to vector<2x7xf32>
    %33 = arith.subf %31, %32 : vector<2x7xf32>
    %cst_26 = arith.constant 5.000000e-01 : f32
    %34 = vector.broadcast %cst_26 : f32 to vector<2x7xf32>
    %35 = arith.mulf %34, %2 : vector<2x7xf32>
    %36 = arith.mulf %35, %2 : vector<2x7xf32>
    %37 = arith.subf %33, %36 : vector<2x7xf32>
    %c0_27 = arith.constant 0 : index
    %c0_28 = arith.constant 0 : index
    %c0_29 = arith.constant 0 : index
    %38 = vector.load %arg10[%c0_27, %c0_28, %c0_29] : memref<2x1x7xf32, #tpu.memory_space<vmem>>, vector<1x1x7xf32>
    %39 = vector.shape_cast %38 : vector<1x1x7xf32> to vector<1x7xf32>
    %c1 = arith.constant 1 : index
    %c0_30 = arith.constant 0 : index
    %c0_31 = arith.constant 0 : index
    %40 = vector.load %arg10[%c1, %c0_30, %c0_31] : memref<2x1x7xf32, #tpu.memory_space<vmem>>, vector<1x1x7xf32>
    %41 = vector.shape_cast %40 : vector<1x1x7xf32> to vector<1x7xf32>
    %cst_32 = arith.constant -5.000000e-01 : f32
    %42 = vector.broadcast %cst_32 : f32 to vector<1x7xf32>
    %43 = arith.mulf %42, %41 : vector<1x7xf32>
    %44 = math.exp %43 : vector<1x7xf32>
    %cst_33 = arith.constant 4.000000e+00 : f32
    %45 = vector.broadcast %cst_33 : f32 to vector<1x7xf32>
    %46 = arith.mulf %45, %44 : vector<1x7xf32>
    %47 = arith.subf %39, %46 : vector<1x7xf32>
    %cst_34 = arith.constant 4.000000e+00 : f32
    %48 = vector.broadcast %cst_34 : f32 to vector<1x7xf32>
    %49 = arith.mulf %48, %44 : vector<1x7xf32>
    %50 = arith.addf %39, %49 : vector<1x7xf32>
    %51 = vector.broadcast %47 : vector<1x7xf32> to vector<2x7xf32>
    %52 = arith.maximumf %51, %29 : vector<2x7xf32>
    %53 = vector.broadcast %50 : vector<1x7xf32> to vector<2x7xf32>
    %54 = arith.minimumf %53, %52 : vector<2x7xf32>
    %cst_35 = arith.constant 5.000000e-01 : f32
    %55 = vector.broadcast %cst_35 : f32 to vector<1x7xf32>
    %56 = arith.mulf %55, %41 : vector<1x7xf32>
    %cst_36 = arith.constant 0.918938517 : f32
    %57 = vector.broadcast %cst_36 : f32 to vector<1x7xf32>
    %58 = arith.subf %56, %57 : vector<1x7xf32>
    %59 = math.exp %41 : vector<1x7xf32>
    %cst_37 = arith.constant 5.000000e-01 : f32
    %60 = vector.broadcast %cst_37 : f32 to vector<1x7xf32>
    %61 = arith.mulf %60, %59 : vector<1x7xf32>
    %62 = vector.broadcast %39 : vector<1x7xf32> to vector<2x7xf32>
    %63 = arith.subf %29, %62 : vector<2x7xf32>
    %64 = arith.mulf %63, %63 : vector<2x7xf32>
    %65 = vector.broadcast %61 : vector<1x7xf32> to vector<2x7xf32>
    %66 = arith.mulf %65, %64 : vector<2x7xf32>
    %67 = vector.broadcast %58 : vector<1x7xf32> to vector<2x7xf32>
    %68 = arith.subf %67, %66 : vector<2x7xf32>
    %cst_38 = arith.constant 0.000000e+00 : f32
    %69 = vector.broadcast %cst_38 : f32 to vector<5x2x128xf32>
    %c0_39 = arith.constant 0 : index
    %c0_40 = arith.constant 0 : index
    %c0_41 = arith.constant 0 : index
    %70 = vector.load %arg11[%c0_39, %c0_40, %c0_41] : memref<5x2x128xf32, #tpu.memory_space<vmem>>, vector<5x2x128xf32>
    tpu.vector_store %arg11[%c0_39, %c0_40, %c0_41], %69 {strides = array<i32>} : memref<5x2x128xf32, #tpu.memory_space<vmem>>, vector<5x2x128xf32>,
    %c0_42 = arith.constant 0 : index
    %c0_43 = arith.constant 0 : index
    %c0_44 = arith.constant 0 : index
    %71 = vector.load %arg11[%c0_42, %c0_43, %c0_44] : memref<5x2x128xf32, #tpu.memory_space<vmem>>, vector<1x2x32xf32>
    %72 = vector.shape_cast %71 : vector<1x2x32xf32> to vector<2x32xf32>
    %73 = vector.shape_cast %14 : vector<2x32xf32> to vector<1x2x32xf32>
    tpu.vector_store %arg11[%c0_42, %c0_43, %c0_44], %73 {strides = array<i32>} : memref<5x2x128xf32, #tpu.memory_space<vmem>>, vector<1x2x32xf32>,
    %c1_45 = arith.constant 1 : index
    %c0_46 = arith.constant 0 : index
    %c0_47 = arith.constant 0 : index
    %74 = vector.load %arg11[%c1_45, %c0_46, %c0_47] : memref<5x2x128xf32, #tpu.memory_space<vmem>>, vector<1x2x7xf32>
    %75 = vector.shape_cast %74 : vector<1x2x7xf32> to vector<2x7xf32>
    %76 = vector.shape_cast %29 : vector<2x7xf32> to vector<1x2x7xf32>
    tpu.vector_store %arg11[%c1_45, %c0_46, %c0_47], %76 {strides = array<i32>} : memref<5x2x128xf32, #tpu.memory_space<vmem>>, vector<1x2x7xf32>,
    %c2 = arith.constant 2 : index
    %c0_48 = arith.constant 0 : index
    %c0_49 = arith.constant 0 : index
    %77 = vector.load %arg11[%c2, %c0_48, %c0_49] : memref<5x2x128xf32, #tpu.memory_space<vmem>>, vector<1x2x7xf32>
    %78 = vector.shape_cast %77 : vector<1x2x7xf32> to vector<2x7xf32>
    %79 = vector.shape_cast %54 : vector<2x7xf32> to vector<1x2x7xf32>
    tpu.vector_store %arg11[%c2, %c0_48, %c0_49], %79 {strides = array<i32>} : memref<5x2x128xf32, #tpu.memory_space<vmem>>, vector<1x2x7xf32>,
    %c3 = arith.constant 3 : index
    %c0_50 = arith.constant 0 : index
    %c0_51 = arith.constant 0 : index
    %80 = vector.load %arg11[%c3, %c0_50, %c0_51] : memref<5x2x128xf32, #tpu.memory_space<vmem>>, vector<1x2x7xf32>
    %81 = vector.shape_cast %80 : vector<1x2x7xf32> to vector<2x7xf32>
    %82 = vector.shape_cast %37 : vector<2x7xf32> to vector<1x2x7xf32>
    tpu.vector_store %arg11[%c3, %c0_50, %c0_51], %82 {strides = array<i32>} : memref<5x2x128xf32, #tpu.memory_space<vmem>>, vector<1x2x7xf32>,
    %c4 = arith.constant 4 : index
    %c0_52 = arith.constant 0 : index
    %c0_53 = arith.constant 0 : index
    %83 = vector.load %arg11[%c4, %c0_52, %c0_53] : memref<5x2x128xf32, #tpu.memory_space<vmem>>, vector<1x2x7xf32>
    %84 = vector.shape_cast %83 : vector<1x2x7xf32> to vector<2x7xf32>
    %85 = vector.shape_cast %68 : vector<2x7xf32> to vector<1x2x7xf32>
    tpu.vector_store %arg11[%c4, %c0_52, %c0_53], %85 {strides = array<i32>} : memref<5x2x128xf32, #tpu.memory_space<vmem>>, vector<1x2x7xf32>,
    return
  }
}

</mosaic_0001>

<bundles_post_ra>
// kernel: encoder_forward.1
= control target key start
LH: loop header
LB: loop body
LE: loop exit
PB: predicated region body
PF: predicated region fallthrough
CT: control target
= control target key end

     0   :  { %vm53_vm0 = vcmask 523264   ;;  %vm95_vm1 = vcmask 850944   ;;  %vm128_vm2 = vcmask 1043456   ;;  %v287_v31 = vmov 0.0   ;;  %s288_s18 = smov 7   ;;  %s489_s3 = inlined_call_operand.vmem [shape: f32[64,104], index: 3, kind: input, shape index: {}]   ;;  %s490_s5 = inlined_call_operand.vmem [shape: f32[104,32], index: 5, kind: input, shape index: {}]   ;;  %s491_s4 = inlined_call_operand.vmem [shape: f32[1,104], index: 4, kind: input, shape index: {}]   ;;  %s492_s0 = inlined_call_operand.vmem [shape: f32[2,64], index: 0, kind: input, shape index: {}]   ;;  %s493_s6 = inlined_call_operand.vmem [shape: f32[1,32], index: 6, kind: input, shape index: {}]   ;;  %s494_s7 = inlined_call_operand.vmem [shape: f32[32,14], index: 7, kind: input, shape index: {}]   ;;  %s495_s8 = inlined_call_operand.vmem [shape: f32[4,14], index: 8, kind: input, shape index: {}]   ;;  %s496_s11 = inlined_call_operand.vmem [shape: f32[5,2,128], index: 11, kind: output, shape index: {}]   ;;  %s497_s1 = inlined_call_operand.vmem [shape: f32[2,4], index: 1, kind: input, shape index: {}]   ;;  %s498_s2 = inlined_call_operand.vmem [shape: f32[2,7], index: 2, kind: input, shape index: {}]   ;;  %s499_s9 = inlined_call_operand.vmem [shape: f32[1,14], index: 9, kind: input, shape index: {}]   ;;  %s500_s10 = inlined_call_operand.vmem [shape: f32[2,1,7], index: 10, kind: input, shape index: {}]  }
   0x1   :  { %v48_v0 = vld [vmem:[%s489_s3 + $0x38] sm:$0xff]  ;;  %v47_v1 = vld [vmem:[%s489_s3 + $0x30] sm:$0xff]  ;;  %v46_v2 = vld [vmem:[%s489_s3 + $0x28] sm:$0xff]  ;;  %238 = vst [vmem:[%s496_s11] sm:$0x3] %v287_v31  ;;  %vm124_vm3 = vcmask 31744   ;;  %vm243_vm4 = vcmask 254976  }
   0x2   :  { %65 = vmatpush.msra.mxu0 %v48_v0  ;;  %v90_v3 = vld [vmem:[%s490_s5 + $0x60] sm:$0xff]  ;;  %v89_v4 = vld [vmem:[%s490_s5 + $0x58] sm:$0xff]  ;;  %v88_v6 = vld [vmem:[%s490_s5 + $0x50] sm:$0xff]  ;;  %239 = vst [vmem:[%s496_s11 + $0x2] sm:$0x3] %v287_v31  ;;  %vm152_vm5 = vcmask 261120  }
   0x3   :  { %v45_v5 = vld [vmem:[%s489_s3 + $0x20] sm:$0xff]  ;;  %102 = vmatpush.msra.mxu1 %v90_v3  ;;  %v44_v7 = vld [vmem:[%s489_s3 + $0x18] sm:$0xff]  ;;  %v87_v8 = vld [vmem:[%s490_s5 + $0x48] sm:$0xff]  ;;  %240 = vst [vmem:[%s496_s11 + $0x4] sm:$0x3] %v287_v31  ;;  %vm246_vm6 = vcmask 50176  }
   0x4   :  { %66 = vmatpush.msra.mxu0 %v47_v1  ;;  %v43_v9 = vld [vmem:[%s489_s3 + $0x10] sm:$0xff]  ;;  %v86_v10 = vld [vmem:[%s490_s5 + $0x40] sm:$0xff]  ;;  %v42_v11 = vld [vmem:[%s489_s3 + $0x8] sm:$0xff]  ;;  %241 = vst [vmem:[%s496_s11 + $0x6] sm:$0x3] %v287_v31 }
   0x5   :  { %103 = vmatpush.msra.mxu1 %v89_v4  ;;  %v85_v12 = vld [vmem:[%s490_s5 + $0x38] sm:$0xff]  ;;  %v41_v13 = vld [vmem:[%s489_s3] sm:$0xff]  ;;  %v84_v15 = vld [vmem:[%s490_s5 + $0x30] sm:$0xff]  ;;  %242 = vst [vmem:[%s496_s11 + $0x8] sm:$0x3] %v287_v31 }
   0x6   :  { %67 = vmatpush.msra.mxu0 %v46_v2  ;;  %v38_v14 = vld [vmem:[%s492_s0] sm:$0x3]  ;;  %v83_v16 = vld [vmem:[%s490_s5 + $0x28] sm:$0xff]  ;;  %v81_v18 = vld [vmem:[%s490_s5 + $0x18] sm:$0xff] }
   0x7   :  { %104 = vmatpush.msra.mxu1 %v88_v6  ;;  %v82_v17 = vld [vmem:[%s490_s5 + $0x20] sm:$0xff]  ;;  %v80_v19 = vld [vmem:[%s490_s5 + $0x10] sm:$0xff]  ;;  %v79_v20 = vld [vmem:[%s490_s5 + $0x8] sm:$0xff] }
   0x8   :  { %68 = vmatpush.msra.mxu0 %v45_v5  ;;  %v78_v21 = vld [vmem:[%s490_s5] sm:$0xff]  ;;  %v122_v22 = vld [vmem:[%s494_s7 + $0x18] sm:$0xff]  ;;  %v121_v23 = vld [vmem:[%s494_s7 + $0x10] sm:$0xff] }
   0x9   :  { %105 = vmatpush.msra.mxu1 %v87_v8  ;;  %168 = vmatpush.msra.mxu3 %v122_v22  ;;  %v277_v24 = vld [vmem:[%s491_s4] ss:$0 sm:$0xff]  ;;  %v120_v28 = vld [vmem:[%s494_s7 + $0x8] sm:$0xff]  ;;  %v268_v53 = vld [vmem:[%s500_s10 + $0x1] sm:$0x1] }
   0xa   :  { %69 = vmatpush.msra.mxu0 %v44_v7  ;;  %v123_v29 = vld [vmem:[%s495_s8] sm:$0xf]  ;;  %v206_v54 = vmul.f32 -0.5, %v268_v53  ;;  %v222_v56 = vmul.f32 1.442695, %v268_v53  ;;  %v220_v63 = vmul.f32 0.5, %v268_v53 }
   0xb   :  { %106 = vmatpush.msra.mxu1 %v86_v10  ;;  %169 = vmatpush.msra.mxu3 %v121_v23  ;;  %v119_v30 = vld [vmem:[%s494_s7] sm:$0xff] }
   0xc   :  { %70 = vmatpush.msra.mxu0 %v43_v9  ;;  %264 = vmatpush.msk.msra.mxu2 %vm128_vm2, %v123_v29  ;;  %v39_v32 = vld [vmem:[%s497_s1] sm:$0x3]  ;;  %v207_v55 = vmul.f32 1.442695, %v206_v54  ;;  %v269_v5 = vadd.f32 -0.9189385, %v220_v63 }
   0xd   :  { %107 = vmatpush.msra.mxu1 %v85_v12  ;;  %170 = vmatpush.msra.mxu3 %v120_v28  ;;  %v40_v33 = vld [vmem:[%s498_s2] sm:$0x3] }
   0xe   :  { %71 = vmatpush.msra.mxu0 %v42_v11  ;;  %265 = vmatmul.msk.f32.vlgmr.msra.gmra.mxu2 %vm124_vm3, %v39_v32  ;;  %v196_v34 = vmul.f32 0.5, %v40_v33  ;;  %v278_v36 = vld [vmem:[%s493_s6] ss:$0 sm:$0xff]  ;;  %s289_s6 = smov 121   ;;  %v235_v10 = vperm.slane %v269_v5, 0 }
   0xf   :  { %108 = vmatpush.msra.mxu1 %v84_v15  ;;  %171 = vmatpush.msra.mxu3 %v119_v30  ;;  %v279_v40 = vld [vmem:[%s499_s9] ss:$0 sm:$0xff] }
  0x10   :  { %72 = vmatpush.msra.mxu0 %v41_v13  ;;  %185 = vrot.lane.b32.xlu0 %v40_v33, %s288_s18  ;;  %v197_v35 = vmul.f32 %v196_v34, %v40_v33  ;;  %v203_v59 = vld [vmem:[%s500_s10] sm:$0x1] }
  0x11   :  { %262 = vmatmul.msk.f32.vlgmr.msra.gmra.mxu0 %vm53_vm0, %v38_v14  ;;  %109 = vmatpush.msra.mxu1 %v83_v16  ;;  %v280_v2 = vld [vmem:[%s500_s10] ss:$0 sm:$0xff] }
  0x13   :  { %110 = vmatpush.msra.mxu1 %v82_v17 }
  0x15   :  { %111 = vmatpush.msra.mxu1 %v81_v18 }
  0x17   :  { %112 = vmatpush.msra.mxu1 %v80_v19 }
  0x18   :  { %199 = vrot.lane.b32.xlu0 %v197_v35, %s288_s18 }
  0x19   :  { %113 = vmatpush.msra.mxu1 %v79_v20 }
  0x1b   :  { %114 = vmatpush.msra.mxu1 %v78_v21 }
  0x82   :  { %v186_v46 = vpop.permute.xlu0 %185 }
  0x8a   :  { %v200_v51 = vpop.permute.xlu0 %199 }
  0x8e   :  { %v74_v25 = vpop.f32.mrf.mxu0 }
  0x8f   :  { %v75_v26 = vadd.f32 %v277_v24, %v74_v25 }
  0x91   :  { %v77_v27 = vmax.f32 %v75_v26, 0.0  ;;  %v149_v39 = vpop.f32.mrf.mxu2 }
  0x93   :  { %263 = vmatmul.msk.f32.vlgmr.msra.gmra.mxu1 %vm95_vm1, %v77_v27 }
 0x110   :  { %v116_v37 = vpop.f32.mrf.mxu1 }
 0x111   :  { %v117_v38 = vadd.f32 %v278_v36, %v116_v37 }
 0x113   :  { %244 = vst.msk [vmem:[%s496_s11] sm:$0x3] %vm243_vm4, %v117_v38  ;;  %266 = vmatmul.msk.f32.vlgmr.msra.gmra.mxu3 %vm152_vm5, %v117_v38 }
 0x196   :  { %v173_v41 = vpop.f32.mrf.mxu3 }
 0x197   :  { %v174_v42 = vadd.f32 %v173_v41, %v149_v39 }
 0x199   :  { %v180_v43 = vadd.f32 %v279_v40, %v174_v42 }
 0x19b   :  { %v181_v44 = vmul.f32 -0.5, %v180_v43  ;;  %v194_v48 = vmul.f32 0.5, %v180_v43 }
 0x19d   :  { %v182_v45 = vmul.f32 1.442695, %v181_v44  ;;  %v267_v50 = vadd.f32 -0.9189385, %v194_v48 }
 0x19f   :  { %281 = vpow2.f32 %v182_v45  ;;  %v202_v52 = vsub.f32 %v267_v50, %v200_v51 }
 0x1a0   :  { %283 = vpow2.f32 %v207_v55 }
 0x1a1   :  { %285 = vpow2.f32 %v222_v56 }
 0x1a5   :  { %v282_v47 = vpop.eup %281 }
 0x1a6   :  { %v188_v49 = vmul.f32 %v282_v47, %v186_v46  ;;  %v284_v57 = vpop.eup %283 }
 0x1a7   :  { %v209_v58 = vmul.f32 4.0, %v284_v57  ;;  %v286_v61 = vpop.eup %285 }
 0x1a8   :  { %190 = vrot.lane.b32.xlu1 %v188_v49, %s289_s6  ;;  %v224_v1 = vmul.f32 0.5, %v286_v61 }
 0x1a9   :  { %v210_v60 = vsub.f32 %v203_v59, %v209_v58  ;;  %v211_v62 = vadd.f32 %v209_v58, %v203_v59 }
 0x1aa   :  { %v231_v7 = vperm.slane %v224_v1, 0 }
 0x1ab   :  { %v213_v0 = vperm.slane %v210_v60, 0  ;;  %v217_v4 = vperm.slane %v211_v62, 0 }
 0x1b0   :  { %251 = vrot.lane.b32.xlu1 %v202_v52, %s289_s6 }
 0x21a   :  { %v191_v3 = vpop.permute.xlu1 %190 }
 0x21b   :  { %v193_v6 = vadd.f32 %v191_v3, %v180_v43 }
 0x21d   :  { %v215_v8 = vmax.f32 %v213_v0, %v193_v6  ;;  %v228_v9 = vsub.f32 %v193_v6, %v280_v2  ;;  %270 = vst.msk [vmem:[%s496_s11 + $0x2] sm:$0x3] %vm246_vm6, %v193_v6 }
 0x21f   :  { %v219_v11 = vmin.f32 %v217_v4, %v215_v8  ;;  %v229_v12 = vmul.f32 %v228_v9, %v228_v9 }
 0x221   :  { %v233_v13 = vmul.f32 %v231_v7, %v229_v12  ;;  %271 = vst.msk [vmem:[%s496_s11 + $0x4] sm:$0x3] %vm246_vm6, %v219_v11 }
 0x222   :  { %v252_v14 = vpop.permute.xlu1 %251 }
 0x223   :  { %v237_v15 = vsub.f32 %v235_v10, %v233_v13  ;;  %272 = vst.msk [vmem:[%s496_s11 + $0x6] sm:$0x3] %vm246_vm6, %v252_v14 }
 0x225   :  { %273 = vst.msk [vmem:[%s496_s11 + $0x8] sm:$0x3] %vm246_vm6, %v237_v15 }

</bundles_post_ra>
